<compile_context>
chip_gen: v5e
topology: v5e:2x2
jax: 0.10.0
libtpu: 0.0.40
codegen_flags: <defaults>
</compile_context>

<pallas_src>
import functools

import jax
import jax.numpy as jnp
from jax import lax
from jax.experimental import pallas as pl
from jax.experimental.pallas import tpu as pltpu


def _bahdanau_kernel(T_valid, t_blk,
                     q_ref, k_ref, wq_t_ref, wk_t_ref, v_ref,
                     ctx_ref, scores_ref,
                     qp_scr, m_scr, l_scr, acc_scr):
    t = pl.program_id(0)
    nt = pl.num_programs(0)

    @pl.when(t == 0)
    def _init():
        # W_q(query) is tiny; compute once, keep resident in VMEM scratch.
        qp_scr[...] = jnp.dot(q_ref[...], wq_t_ref[...],
                              preferred_element_type=jnp.float32)
        m_scr[...] = jnp.full_like(m_scr, -jnp.inf)
        l_scr[...] = jnp.zeros_like(l_scr)
        acc_scr[...] = jnp.zeros_like(acc_scr)

    keys = k_ref[...]                                    # (B, t_blk, H)

    # W_k(keys): contract H with pre-transposed W_k -> (B, t_blk, H) on the MXU.
    kp = lax.dot_general(keys, wk_t_ref[...],
                         dimension_numbers=(((2,), (0,)), ((), ())),
                         preferred_element_type=jnp.float32)

    energy = jnp.tanh(kp + qp_scr[...][:, None, :])      # EUP tanh, fp32

    # V(energy): VPU multiply + lane reduction instead of an N=1 MXU matmul.
    s = jnp.sum(energy * v_ref[...], axis=-1)            # (B, t_blk)

    # Mask padded tail columns (static check: only emitted if T was padded).
    if T_valid % t_blk != 0:
        col = t * t_blk + lax.broadcasted_iota(jnp.int32, s.shape, 1)
        s = jnp.where(col < T_valid, s, -jnp.inf)

    # Online softmax over time; context accumulated in fp32.
    m_old = m_scr[...]                                   # (B, 1)
    m_new = jnp.maximum(m_old, jnp.max(s, axis=1, keepdims=True))
    alpha = jnp.exp(m_old - m_new)
    p = jnp.exp(s - m_new)                               # (B, t_blk), 0 where masked
    l_scr[...] = alpha * l_scr[...] + jnp.sum(p, axis=1, keepdims=True)
    acc_scr[...] = (alpha * acc_scr[...] +
                    jnp.sum(p[:, :, None] * keys.astype(jnp.float32), axis=1))
    m_scr[...] = m_new

    # Lane-dense raw-score tile; normalization happens in the wrapper.
    scores_ref[...] = s.astype(scores_ref.dtype)

    @pl.when(t == nt - 1)
    def _finalize():
        ctx_ref[...] = (acc_scr[...] / l_scr[...]).astype(ctx_ref.dtype)


def bahdanau_attention(query, keys, W_q, W_k, V, *, t_blk=512):
    """query (B,H), keys (T,B,H); W_q/W_k (H,H) and V (1,H) torch-style (out,in).

    Returns (context_vector (B,H), attention_weights (T,B))."""
    B, H = query.shape
    T, Bk, Hk = keys.shape
    assert (B, H) == (Bk, Hk)

    # Relayout keys to (B, T, H): H lane-dense, T on the sublane axis.
    keys_bth = jnp.transpose(keys, (1, 0, 2))

    # Tile choice: a single full-T tile rounded up to a multiple of 8, or a
    # 128-aligned tile (lane-dense score blocks) when streaming multiple tiles.
    if T <= t_blk:
        blk = ((T + 7) // 8) * 8
    else:
        blk = max(128, (t_blk // 128) * 128)
    num_t = pl.cdiv(T, blk)
    T_pad = num_t * blk
    if T_pad != T:
        keys_bth = jnp.pad(keys_bth, ((0, 0), (0, T_pad - T), (0, 0)))

    kernel = functools.partial(_bahdanau_kernel, T, blk)

    flops = 2 * B * T * H * H + 2 * B * H * H + 4 * B * T * H
    transcendentals = B * T * H + B * T                  # tanh + exp
    bytes_accessed = 4 * (keys_bth.size + query.size + W_q.size + W_k.size
                          + V.size + B * H + B * T_pad)

    ctx, scores = pl.pallas_call(
        kernel,
        out_shape=(jax.ShapeDtypeStruct((B, H), query.dtype),
                   jax.ShapeDtypeStruct((B, T_pad), jnp.float32)),
        grid_spec=pltpu.PrefetchScalarGridSpec(
            num_scalar_prefetch=0,
            grid=(num_t,),
            in_specs=[
                pl.BlockSpec((B, H), lambda t: (0, 0)),          # query
                pl.BlockSpec((B, blk, H), lambda t: (0, t, 0)),  # keys tile
                pl.BlockSpec((H, H), lambda t: (0, 0)),          # W_q^T
                pl.BlockSpec((H, H), lambda t: (0, 0)),          # W_k^T
                pl.BlockSpec((1, H), lambda t: (0, 0)),          # V row
            ],
            out_specs=(
                pl.BlockSpec((B, H), lambda t: (0, 0)),          # ctx (resident acc)
                pl.BlockSpec((B, blk), lambda t: (0, t)),        # raw scores tile
            ),
            scratch_shapes=[
                pltpu.VMEM((B, H), jnp.float32),   # qp = W_q(query)
                pltpu.VMEM((B, 1), jnp.float32),   # running max
                pltpu.VMEM((B, 1), jnp.float32),   # running sum
                pltpu.VMEM((B, H), jnp.float32),   # context accumulator
            ]),
        compiler_params=pltpu.CompilerParams(
            # Single online-softmax reduction axis over T.
            # TODO(synk): on v7x, split T into two independent halves (parallel
            # axis) with a tiny (m, l, acc) combine epilogue to use both TCs.
            dimension_semantics=("arbitrary",),
            vmem_limit_bytes=48 * 1024 * 1024),
        cost_estimate=pl.CostEstimate(flops=flops,
                                      transcendentals=transcendentals,
                                      bytes_accessed=bytes_accessed),
    )(query, keys_bth, W_q.T, W_k.T, V)

    # Tiny finalization on (B, T) lane-dense scores, then back to torch's (T, B).
    w = jax.nn.softmax(scores[:, :T], axis=1).astype(query.dtype).T
    return ctx, w


def bahdanau_reference(query, keys, W_q, W_k, V):
    # pure-JAX reference mirroring the PyTorch forward
    qp = query[None] @ W_q.T                                # (1, B, H)
    kp = jnp.einsum('tbh,gh->tbg', keys, W_k)               # (T, B, H)
    energy = jnp.tanh(qp + kp)
    scores = jnp.einsum('tbh,oh->tbo', energy, V)[..., 0]   # (T, B)
    w = jax.nn.softmax(scores, axis=0)
    ctx = jnp.sum(keys * w[:, :, None], axis=0)
    return ctx, w


if __name__ == "__main__":
    B, H = 2, 32
    key = jax.random.PRNGKey(0)
    k_q, k_keys, k_wq, k_wk, k_v = jax.random.split(key, 5)

    bound = 1.0 / (H ** 0.5)
    W_q = jax.random.uniform(k_wq, (H, H), jnp.float32, -bound, bound)
    W_k = jax.random.uniform(k_wk, (H, H), jnp.float32, -bound, bound)
    V = jax.random.uniform(k_v, (1, H), jnp.float32, -bound, bound)
    query = jax.random.normal(k_q, (B, H), dtype=jnp.float32)

    # Case 1: small, single tile (T = 8).
    keys1 = jax.random.normal(k_keys, (8, B, H), dtype=jnp.float32)
    ctx1, w1 = bahdanau_attention(query, keys1, W_q, W_k, V)
    jax.block_until_ready((ctx1, w1))
    ctx1_ref, w1_ref = bahdanau_reference(query, keys1, W_q, W_k, V)
    assert jnp.allclose(ctx1, ctx1_ref, atol=1e-5, rtol=1e-5), "ctx mismatch (T=8)"
    assert jnp.allclose(w1, w1_ref, atol=1e-5, rtol=1e-5), "weights mismatch (T=8)"

    # Case 2: multi-tile online softmax with a padded last tile (T = 300, blk = 128).
    keys2 = jax.random.normal(jax.random.PRNGKey(1), (300, B, H), dtype=jnp.float32)
    ctx2, w2 = bahdanau_attention(query, keys2, W_q, W_k, V, t_blk=128)
    jax.block_until_ready((ctx2, w2))
    ctx2_ref, w2_ref = bahdanau_reference(query, keys2, W_q, W_k, V)
    assert jnp.allclose(ctx2, ctx2_ref, atol=1e-5, rtol=1e-5), "ctx mismatch (T=300)"
    assert jnp.allclose(w2, w2_ref, atol=1e-5, rtol=1e-5), "weights mismatch (T=300)"

    print("KERNEL_OK")
</pallas_src>

<mosaic_0001>
module attributes {stable_mosaic.version = 11 : i64} {
  func.func @_bahdanau_kernel(%arg0: i32, %arg1: memref<2x32xf32, #tpu.memory_space<vmem>>, %arg2: memref<2x8x32xf32, #tpu.memory_space<vmem>>, %arg3: memref<32x32xf32, #tpu.memory_space<vmem>>, %arg4: memref<32x32xf32, #tpu.memory_space<vmem>>, %arg5: memref<1x32xf32, #tpu.memory_space<vmem>>, %arg6: memref<2x32xf32, #tpu.memory_space<vmem>>, %arg7: memref<2x8xf32, #tpu.memory_space<vmem>>, %arg8: memref<2x32xf32, #tpu.memory_space<vmem>>, %arg9: memref<2x1xf32, #tpu.memory_space<vmem>>, %arg10: memref<2x1xf32, #tpu.memory_space<vmem>>, %arg11: memref<2x32xf32, #tpu.memory_space<vmem>>) attributes {dimension_semantics = [#tpu.dimension_semantics<arbitrary>], iteration_bounds = array<i64: 1>, scalar_prefetch = 0 : i64, scratch_operands = 4 : i64, tpu.core_type = #tpu.core_type<tc>, window_params = [{pipeline_mode = #tpu.pipeline_mode<synchronous>, transform_indices = @transform_0, window_bounds = array<i64: 2, 32>}, {transform_indices = @transform_1, window_bounds = array<i64: 2, 8, 32>}, {pipeline_mode = #tpu.pipeline_mode<synchronous>, transform_indices = @transform_2, window_bounds = array<i64: 32, 32>}, {pipeline_mode = #tpu.pipeline_mode<synchronous>, transform_indices = @transform_3, window_bounds = array<i64: 32, 32>}, {pipeline_mode = #tpu.pipeline_mode<synchronous>, transform_indices = @transform_4, window_bounds = array<i64: 1, 32>}, {pipeline_mode = #tpu.pipeline_mode<synchronous>, transform_indices = @transform_5, window_bounds = array<i64: 2, 32>}, {transform_indices = @transform_6, window_bounds = array<i64: 2, 8>}]} {
    %c0_i32 = arith.constant 0 : i32
    %0 = arith.cmpi eq, %arg0, %c0_i32 : i32
    %1 = arith.extui %0 : i1 to i32
    %c0_i32_0 = arith.constant 0 : i32
    %2 = arith.cmpi ne, %1, %c0_i32_0 : i32
    scf.if %2 {
      %c0_29 = arith.constant 0 : index
      %c0_30 = arith.constant 0 : index
      %45 = vector.load %arg1[%c0_29, %c0_30] : memref<2x32xf32, #tpu.memory_space<vmem>>, vector<2x32xf32>
      %c0_31 = arith.constant 0 : index
      %c0_32 = arith.constant 0 : index
      %46 = vector.load %arg3[%c0_31, %c0_32] : memref<32x32xf32, #tpu.memory_space<vmem>>, vector<32x32xf32>
      %cst_33 = arith.constant dense<0.000000e+00> : vector<2x32xf32>
      %47 = tpu.matmul %45, %46, %cst_33 {dimension_numbers = #tpu.dot_dimension_numbers<[1], [0], [0], [1], [0, 0, 1, 1], [], []>} : vector<2x32xf32>, vector<32x32xf32>, vector<2x32xf32> -> vector<2x32xf32>
      %c0_34 = arith.constant 0 : index
      %c0_35 = arith.constant 0 : index
      %48 = vector.load %arg8[%c0_34, %c0_35] : memref<2x32xf32, #tpu.memory_space<vmem>>, vector<2x32xf32>
      tpu.vector_store %arg8[%c0_34, %c0_35], %47 {strides = array<i32>} : memref<2x32xf32, #tpu.memory_space<vmem>>, vector<2x32xf32>,
      %cst_36 = arith.constant 0xFF800000 : f32
      %49 = vector.broadcast %cst_36 : f32 to vector<2x1xf32>
      %c0_37 = arith.constant 0 : index
      %c0_38 = arith.constant 0 : index
      %50 = vector.load %arg9[%c0_37, %c0_38] : memref<2x1xf32, #tpu.memory_space<vmem>>, vector<2x1xf32>
      tpu.vector_store %arg9[%c0_37, %c0_38], %49 {strides = array<i32>} : memref<2x1xf32, #tpu.memory_space<vmem>>, vector<2x1xf32>,
      %cst_39 = arith.constant 0.000000e+00 : f32
      %51 = vector.broadcast %cst_39 : f32 to vector<2x1xf32>
      %c0_40 = arith.constant 0 : index
      %c0_41 = arith.constant 0 : index
      %52 = vector.load %arg10[%c0_40, %c0_41] : memref<2x1xf32, #tpu.memory_space<vmem>>, vector<2x1xf32>
      tpu.vector_store %arg10[%c0_40, %c0_41], %51 {strides = array<i32>} : memref<2x1xf32, #tpu.memory_space<vmem>>, vector<2x1xf32>,
      %cst_42 = arith.constant 0.000000e+00 : f32
      %53 = vector.broadcast %cst_42 : f32 to vector<2x32xf32>
      %c0_43 = arith.constant 0 : index
      %c0_44 = arith.constant 0 : index
      %54 = vector.load %arg11[%c0_43, %c0_44] : memref<2x32xf32, #tpu.memory_space<vmem>>, vector<2x32xf32>
      tpu.vector_store %arg11[%c0_43, %c0_44], %53 {strides = array<i32>} : memref<2x32xf32, #tpu.memory_space<vmem>>, vector<2x32xf32>,
    } else {
    }
    %c0 = arith.constant 0 : index
    %c0_1 = arith.constant 0 : index
    %c0_2 = arith.constant 0 : index
    %3 = vector.load %arg2[%c0, %c0_1, %c0_2] : memref<2x8x32xf32, #tpu.memory_space<vmem>>, vector<2x8x32xf32>
    %c0_3 = arith.constant 0 : index
    %c0_4 = arith.constant 0 : index
    %4 = vector.load %arg4[%c0_3, %c0_4] : memref<32x32xf32, #tpu.memory_space<vmem>>, vector<32x32xf32>
    %cst = arith.constant dense<0.000000e+00> : vector<2x8x32xf32>
    %5 = tpu.matmul %3, %4, %cst {dimension_numbers = #tpu.dot_dimension_numbers<[2], [0], [0, 1], [1], [0, 0, 0, 1, 1, 1], [], []>} : vector<2x8x32xf32>, vector<32x32xf32>, vector<2x8x32xf32> -> vector<2x8x32xf32>
    %c0_5 = arith.constant 0 : index
    %c0_6 = arith.constant 0 : index
    %6 = vector.load %arg8[%c0_5, %c0_6] : memref<2x32xf32, #tpu.memory_space<vmem>>, vector<2x32xf32>
    %7 = vector.shape_cast %6 : vector<2x32xf32> to vector<2x1x32xf32>
    %8 = vector.broadcast %7 : vector<2x1x32xf32> to vector<2x8x32xf32>
    %9 = arith.addf %5, %8 : vector<2x8x32xf32>
    %10 = math.tanh %9 : vector<2x8x32xf32>
    %c0_7 = arith.constant 0 : index
    %c0_8 = arith.constant 0 : index
    %11 = vector.load %arg5[%c0_7, %c0_8] : memref<1x32xf32, #tpu.memory_space<vmem>>, vector<1x32xf32>
    %12 = vector.shape_cast %11 : vector<1x32xf32> to vector<1x1x32xf32>
    %13 = vector.broadcast %12 : vector<1x1x32xf32> to vector<2x8x32xf32>
    %14 = arith.mulf %10, %13 : vector<2x8x32xf32>
    %cst_9 = arith.constant dense<0.000000e+00> : vector<2x8xf32>
    %15 = vector.multi_reduction <add>, %14, %cst_9 [2] : vector<2x8x32xf32> to vector<2x8xf32>
    %c0_10 = arith.constant 0 : index
    %c0_11 = arith.constant 0 : index
    %16 = vector.load %arg9[%c0_10, %c0_11] : memref<2x1xf32, #tpu.memory_space<vmem>>, vector<2x1xf32>
    %cst_12 = arith.constant dense<0xFF800000> : vector<2xf32>
    %17 = vector.multi_reduction <maximumf>, %15, %cst_12 [1] : vector<2x8xf32> to vector<2xf32>
    %18 = vector.shape_cast %17 : vector<2xf32> to vector<2x1xf32>
    %19 = arith.maximumf %16, %18 : vector<2x1xf32>
    %20 = arith.subf %16, %19 : vector<2x1xf32>
    %21 = math.exp %20 : vector<2x1xf32>
    %22 = vector.broadcast %19 : vector<2x1xf32> to vector<2x8xf32>
    %23 = arith.subf %15, %22 : vector<2x8xf32>
    %24 = math.exp %23 : vector<2x8xf32>
    %c0_13 = arith.constant 0 : index
    %c0_14 = arith.constant 0 : index
    %25 = vector.load %arg10[%c0_13, %c0_14] : memref<2x1xf32, #tpu.memory_space<vmem>>, vector<2x1xf32>
    %26 = arith.mulf %21, %25 : vector<2x1xf32>
    %cst_15 = arith.constant dense<0.000000e+00> : vector<2xf32>
    %27 = vector.multi_reduction <add>, %24, %cst_15 [1] : vector<2x8xf32> to vector<2xf32>
    %28 = vector.shape_cast %27 : vector<2xf32> to vector<2x1xf32>
    %29 = arith.addf %26, %28 : vector<2x1xf32>
    %c0_16 = arith.constant 0 : index
    %c0_17 = arith.constant 0 : index
    %30 = vector.load %arg10[%c0_16, %c0_17] : memref<2x1xf32, #tpu.memory_space<vmem>>, vector<2x1xf32>
    tpu.vector_store %arg10[%c0_16, %c0_17], %29 {strides = array<i32>} : memref<2x1xf32, #tpu.memory_space<vmem>>, vector<2x1xf32>,
    %c0_18 = arith.constant 0 : index
    %c0_19 = arith.constant 0 : index
    %31 = vector.load %arg11[%c0_18, %c0_19] : memref<2x32xf32, #tpu.memory_space<vmem>>, vector<2x32xf32>
    %32 = vector.broadcast %21 : vector<2x1xf32> to vector<2x32xf32>
    %33 = arith.mulf %32, %31 : vector<2x32xf32>
    %34 = vector.shape_cast %24 : vector<2x8xf32> to vector<2x8x1xf32>
    %35 = vector.broadcast %34 : vector<2x8x1xf32> to vector<2x8x32xf32>
    %36 = arith.mulf %35, %3 : vector<2x8x32xf32>
    %cst_20 = arith.constant dense<0.000000e+00> : vector<2x32xf32>
    %37 = vector.multi_reduction <add>, %36, %cst_20 [1] : vector<2x8x32xf32> to vector<2x32xf32>
    %38 = arith.addf %33, %37 : vector<2x32xf32>
    %c0_21 = arith.constant 0 : index
    %c0_22 = arith.constant 0 : index
    %39 = vector.load %arg11[%c0_21, %c0_22] : memref<2x32xf32, #tpu.memory_space<vmem>>, vector<2x32xf32>
    tpu.vector_store %arg11[%c0_21, %c0_22], %38 {strides = array<i32>} : memref<2x32xf32, #tpu.memory_space<vmem>>, vector<2x32xf32>,
    %c0_23 = arith.constant 0 : index
    %c0_24 = arith.constant 0 : index
    %40 = vector.load %arg9[%c0_23, %c0_24] : memref<2x1xf32, #tpu.memory_space<vmem>>, vector<2x1xf32>
    tpu.vector_store %arg9[%c0_23, %c0_24], %19 {strides = array<i32>} : memref<2x1xf32, #tpu.memory_space<vmem>>, vector<2x1xf32>,
    %c0_25 = arith.constant 0 : index
    %c0_26 = arith.constant 0 : index
    %41 = vector.load %arg7[%c0_25, %c0_26] : memref<2x8xf32, #tpu.memory_space<vmem>>, vector<2x8xf32>
    tpu.vector_store %arg7[%c0_25, %c0_26], %15 {strides = array<i32>} : memref<2x8xf32, #tpu.memory_space<vmem>>, vector<2x8xf32>,
    %c0_i32_27 = arith.constant 0 : i32
    %42 = arith.cmpi eq, %arg0, %c0_i32_27 : i32
    %43 = arith.extui %42 : i1 to i32
    %c0_i32_28 = arith.constant 0 : i32
    %44 = arith.cmpi ne, %43, %c0_i32_28 : i32
    scf.if %44 {
      %c0_29 = arith.constant 0 : index
      %c0_30 = arith.constant 0 : index
      %45 = vector.load %arg11[%c0_29, %c0_30] : memref<2x32xf32, #tpu.memory_space<vmem>>, vector<2x32xf32>
      %c0_31 = arith.constant 0 : index
      %c0_32 = arith.constant 0 : index
      %46 = vector.load %arg10[%c0_31, %c0_32] : memref<2x1xf32, #tpu.memory_space<vmem>>, vector<2x1xf32>
      %47 = vector.broadcast %46 : vector<2x1xf32> to vector<2x32xf32>
      %48 = arith.divf %45, %47 : vector<2x32xf32>
      %c0_33 = arith.constant 0 : index
      %c0_34 = arith.constant 0 : index
      %49 = vector.load %arg6[%c0_33, %c0_34] : memref<2x32xf32, #tpu.memory_space<vmem>>, vector<2x32xf32>
      tpu.vector_store %arg6[%c0_33, %c0_34], %48 {strides = array<i32>} : memref<2x32xf32, #tpu.memory_space<vmem>>, vector<2x32xf32>,
    } else {
    }
    return
  }
  func.func @transform_0(%arg0: i32) -> (i32, i32) {
    %c0_i32 = arith.constant 0 : i32
    %c0_i32_0 = arith.constant 0 : i32
    %c0_i32_1 = arith.constant 0 : i32
    return %c0_i32, %c0_i32_0 : i32, i32
  }
  func.func @transform_1(%arg0: i32) -> (i32, i32, i32) {
    %c0_i32 = arith.constant 0 : i32
    %c0_i32_0 = arith.constant 0 : i32
    %c0_i32_1 = arith.constant 0 : i32
    return %c0_i32, %arg0, %c0_i32_0 : i32, i32, i32
  }
  func.func @transform_2(%arg0: i32) -> (i32, i32) {
    %c0_i32 = arith.constant 0 : i32
    %c0_i32_0 = arith.constant 0 : i32
    %c0_i32_1 = arith.constant 0 : i32
    return %c0_i32, %c0_i32_0 : i32, i32
  }
  func.func @transform_3(%arg0: i32) -> (i32, i32) {
    %c0_i32 = arith.constant 0 : i32
    %c0_i32_0 = arith.constant 0 : i32
    %c0_i32_1 = arith.constant 0 : i32
    return %c0_i32, %c0_i32_0 : i32, i32
  }
  func.func @transform_4(%arg0: i32) -> (i32, i32) {
    %c0_i32 = arith.constant 0 : i32
    %c0_i32_0 = arith.constant 0 : i32
    %c0_i32_1 = arith.constant 0 : i32
    return %c0_i32, %c0_i32_0 : i32, i32
  }
  func.func @transform_5(%arg0: i32) -> (i32, i32) {
    %c0_i32 = arith.constant 0 : i32
    %c0_i32_0 = arith.constant 0 : i32
    %c0_i32_1 = arith.constant 0 : i32
    return %c0_i32, %c0_i32_0 : i32, i32
  }
  func.func @transform_6(%arg0: i32) -> (i32, i32) {
    %c0_i32 = arith.constant 0 : i32
    %c0_i32_0 = arith.constant 0 : i32
    return %c0_i32, %arg0 : i32, i32
  }
}

</mosaic_0001>

<bundles_post_ra>
// kernel: tpu_custom_call.1
= control target key start
LH: loop header
LB: loop body
LE: loop exit
PB: predicated region body
PF: predicated region fallthrough
CT: control target
= control target key end

     0   :  { %12 = vsyncpa [#allocation7], 0  ;;  %s612_s0 = inlined_call_operand.hbm [shape: f32[2,32], index: 0, kind: input, shape index: {}]   ;;  %s613_s1 = inlined_call_operand.hbm [shape: f32[2,8,32], index: 1, kind: input, shape index: {}]   ;;  %s614_s2 = inlined_call_operand.hbm [shape: f32[32,32], index: 2, kind: input, shape index: {}]   ;;  %s615_s3 = inlined_call_operand.hbm [shape: f32[32,32], index: 3, kind: input, shape index: {}]   ;;  %s616_s4 = inlined_call_operand.vmem [shape: f32[1,32], index: 4, kind: input, shape index: {}]   ;;  %s617_s5 = inlined_call_operand.hbm [shape: f32[2,32], index: 5, kind: output, shape index: {0}]   ;;  %s618_s6 = inlined_call_operand.hbm [shape: f32[2,8], index: 6, kind: output, shape index: {1}]  }
   0x1   :  { %13 = vsyncpa [#allocation10], 0 }
   0x2   :  { %14 = vsyncpa [#allocation13], 0 }
   0x3   :  { %15 = vsyncpa [#allocation8], 0  ;;  %s32_s23 = sshll.u32 %s613_s1, 4  ;;  %s33_s23 = int_to_ptr.hbm [resolvable:$true] %s32_s23 }
   0x4   :  { %16 = vsyncpa [#allocation16], 0  ;;  %s516_s24 = smov [#allocation9]   ;;  %s22_s28 = sshll.u32 %s612_s0, 4  ;;  %s23_s28 = int_to_ptr.hbm [resolvable:$true] %s22_s28 }
   0x5   :  { %s34_s25 = sshll.u32 %s516_s24, 4  ;;  %s517_s29 = smov 128   ;;  %s35_s25 = int_to_ptr.vmem [resolvable:$true] %s34_s25 }
   0x6   :  { %s518_s30 = smov 8   ;;  %s519_s7 = smov [#allocation6]  }
   0x7   :  { %40 = dma.hbm_to_vmem [thread:$0]  %s33_s23, 256, %s35_s25, [#allocation10], %s517_s29, %s517_s29, %s518_s30  }
   0x8   :  { %s24_s8 = sshll.u32 %s519_s7, 4  ;;  %s45_s11 = sshll.u32 %s614_s2, 4  ;;  %s25_s8 = int_to_ptr.vmem [resolvable:$true] %s24_s8  ;;  %s46_s11 = int_to_ptr.hbm [resolvable:$true] %s45_s11 }
   0x9   :  { %27 = dma.hbm_to_vmem [thread:$0]  %s23_s28, 32, %s25_s8, [#allocation7]  }
   0xa   :  { %s58_s13 = sshll.u32 %s615_s3, 4  ;;  %s520_s14 = smov [#allocation11]   ;;  %s59_s13 = int_to_ptr.hbm [resolvable:$true] %s58_s13 }
   0xb   :  { %s47_s15 = sshll.u32 %s520_s14, 4  ;;  %s521_s0 = smov [#allocation12]   ;;  %s48_s15 = int_to_ptr.vmem [resolvable:$true] %s47_s15 }
   0xc   :  { %53 = dma.hbm_to_vmem [thread:$0]  %s46_s11, 512, %s48_s15, [#allocation10], %s517_s29, %s517_s29, %s518_s30  }
   0xd   :  { %s60_s16 = sshll.u32 %s521_s0, 4  ;;  %s61_s16 = int_to_ptr.vmem [resolvable:$true] %s60_s16 }
   0xe   :  { %66 = dma.hbm_to_vmem [thread:$0]  %s59_s13, 512, %s61_s16, [#allocation13], %s517_s29, %s517_s29, %s518_s30  }
   0xf   :  { %506 = dma.done.wait [#allocation7], 32  }
  0x10   :  { %507 = vsyncadd [#allocation7], 4294967264 }
  0x11   :  { %508 = dma.done.wait [#allocation10], 768  }
  0x12   :  { %509 = vsyncadd [#allocation10], 4294966528 }
  0x13   :  { %510 = dma.done.wait [#allocation13], 512  }
  0x14   :  { %511 = vsyncadd [#allocation13], 4294966784  ;;  %v93_v0 = vld [vmem:[#allocation11 + $0x18] sm:$0xff]  ;;  %v92_v1 = vld [vmem:[#allocation11 + $0x10] sm:$0xff]  ;;  %vm94_vm0 = vcmask 261120   ;;  %vm120_vm1 = vcmask 1024   ;;  %v184_v30 = vlaneseq }
  0x15   :  { %110 = vmatpush.msra.mxu0 %v93_v0  ;;  %v129_v2 = vld [vmem:[#allocation12 + $0x18] sm:$0xff]  ;;  %v91_v3 = vld [vmem:[#allocation11 + $0x8] sm:$0xff]  ;;  %v128_v4 = vld [vmem:[#allocation12 + $0x10] sm:$0xff]  ;;  %vm118_vm2 = vcmask 254976   ;;  %v522_v11 = vmov 0.0   ;;  %v523_v28 = vmov -inf  }
  0x16   :  { %331 = vmatpush.msra.mxu2 %v129_v2  ;;  %156 = vmatpush.msra.mxu1 %v129_v2  ;;  %v127_v5 = vld [vmem:[#allocation12 + $0x8] sm:$0xff]  ;;  %v90_v6 = vld [vmem:[#allocation11] sm:$0xff]  ;;  %v574_v9 = vld [vmem:[#allocation9 + $0x8] sm:$0xff]  ;;  %122 = vst.msk [vmem:[#allocation4] sm:$0x3] %vm120_vm1, %v522_v11  ;;  %v185_v31 = vand.u32 127, %v184_v30 }
  0x17   :  { %111 = vmatpush.msra.mxu0 %v92_v1  ;;  %v89_v7 = vld [vmem:[#allocation6] sm:$0x3]  ;;  %v126_v8 = vld [vmem:[#allocation12] sm:$0xff]  ;;  %v576_v10 = vld [vmem:[#allocation9] sm:$0xff]  ;;  %123 = vst.msk [vmem:[#allocation5] sm:$0x3] %vm118_vm2, %v522_v11 }
  0x18   :  { %332 = vmatpush.msra.mxu2 %v128_v4  ;;  %157 = vmatpush.msra.mxu1 %v128_v4  ;;  %v349_v21 = vld [vmem:[%s616_s4] ss:$0 sm:$0xff]  ;;  %121 = vst.msk [vmem:[#allocation3] sm:$0x3] %vm120_vm1, %v523_v28  ;;  %vm188_vm3 = vcmask 1041409   ;;  %vm191_vm4 = vcmask 58368  }
  0x19   :  { %112 = vmatpush.msra.mxu0 %v91_v3  ;;  %v524_v37 = vmov 0   ;;  %s525_s4 = smov [#allocation15]   ;;  %s311_s20 = sshll.u32 %s618_s6, 4  ;;  %s312_s20 = int_to_ptr.hbm [resolvable:$true] %s311_s20 }
  0x1a   :  { %333 = vmatpush.msra.mxu2 %v127_v5  ;;  %158 = vmatpush.msra.mxu1 %v127_v5  ;;  %s309_s17 = sshll.u32 %s525_s4, 4  ;;  %s526_s6 = smov [#allocation14]   ;;  %s310_s17 = int_to_ptr.vmem [resolvable:$true] %s309_s17 }
  0x1b   :  { %113 = vmatpush.msra.mxu0 %v90_v6  ;;  %346 = vset.pattern.permute.xlu1 %v524_v37  ;;  %s298_s21 = sshll.u32 %s526_s6, 4  ;;  %s300_s24 = sshll.u32 %s617_s5, 4  ;;  %s299_s21 = int_to_ptr.vmem [resolvable:$true] %s298_s21  ;;  %s301_s24 = int_to_ptr.hbm [resolvable:$true] %s300_s24 }
  0x1c   :  { %328 = vmatmul.msk.f32.vlgmr.msra.gmra.mxu0 %vm94_vm0, %v89_v7  ;;  %334 = vmatpush.msra.mxu2 %v126_v8 }
  0x1d   :  { %330 = vmatmul.msk.f32.vlgmr.msra.gmra.mxu2 %vm94_vm0, %v574_v9  ;;  %159 = vmatpush.msra.mxu1 %v126_v8  ;;  %v213_v63 = vld [vmem:[#allocation4] sm:$0x3] }
  0x1e   :  { %329 = vmatmul.msk.f32.vlgmr.msra.gmra.mxu1 %vm94_vm0, %v576_v10  ;;  %347 = vset.pattern.permute.xlu2 %v524_v37 }
  0x1f   :  { %348 = vset.pattern.permute.xlu0 %v524_v37  ;;  %v181_v38 = vld [vmem:[#allocation3] sm:$0x3] }
  0x99   :  { %v115_v12 = vpop.f32.mrf.mxu0 }
  0x9a   :  { %119 = vst.msk [vmem:[#allocation2] sm:$0x3] %vm118_vm2, %v115_v12 }
  0x9b   :  { %v161_v14 = vpop.f32.mrf.mxu1 }
  0xa0   :  { %v164_v17 = vpop.f32.mrf.mxu2 }
  0xa1   :  { %v130_v13 = vld [vmem:[#allocation2] sm:$0x3] }
  0xa2   :  { %v133_v15 = vperm.slane %v130_v13, 0  ;;  %v132_v16 = vrot.slane %v130_v13, 1 }
  0xa4   :  { %v162_v18 = vadd.f32 %v161_v14, %v133_v15  ;;  %v134_v19 = vperm.slane %v132_v16, 0  ;;  %v233_v14 = vld [vmem:[#allocation5] sm:$0x3] }
  0xa6   :  { %350 = vtanh.f32 %v162_v18  ;;  %v165_v20 = vadd.f32 %v164_v17, %v134_v19 }
  0xa8   :  { %352 = vtanh.f32 %v165_v20 }
  0xac   :  { %v351_v22 = vpop.eup %350 }
  0xad   :  { %v173_v23 = vmul.f32 %v351_v22, %v349_v21 }
  0xae   :  { %v353_v25 = vpop.eup %352 }
  0xaf   :  { %v175_v24 = vsel %vm94_vm0, %v173_v23, 0.0  ;;  %v174_v26 = vmul.f32 %v353_v25, %v349_v21 }
  0xb0   :  { %176 = vadd.xlane.f32.xlu0 %v175_v24 }
  0xb1   :  { %v178_v27 = vsel %vm94_vm0, %v174_v26, 0.0 }
  0xb8   :  { %179 = vadd.xlane.f32.xlu0 %v178_v27 }
 0x123   :  { %v177_v29 = vpop.xlane.xlu0 %176 }
 0x124   :  { %v186_v33 = vperm.slane %v177_v29, %v185_v31 }
 0x12b   :  { %v180_v32 = vpop.xlane.xlu0 %179 }
 0x12c   :  { %v187_v34 = vperm.slane %v180_v32, %v185_v31 }
 0x12e   :  { %v189_v35 = vsel %vm188_vm3, %v187_v34, %v186_v33 }
 0x12f   :  { %v192_v36 = vsel %vm191_vm4, %v189_v35, -inf  ;;  %266 = vst.msk [vmem:[#allocation15] sm:$0x3] %vm191_vm4, %v189_v35 }
 0x130   :  { %193 = vmax.xlane.f32.xlu1 %v192_v36  ;;  %314 = dma.vmem_to_hbm [thread:$0]  %s310_s17, 32, %s312_s20, [#allocation16]  }
 0x1a3   :  { %v194_v39 = vpop.xlane.xlu1 %193 }
 0x1a4   :  { %v195_v40 = vmax.f32 %v181_v38, %v194_v39 }
 0x1a6   :  { %v196_v41 = vsub.f32 %v181_v38, %v195_v40  ;;  %265 = vst.msk [vmem:[#allocation3] sm:$0x3] %vm120_vm1, %v195_v40  ;;  %201 = vperm.xlu1 %346, %v195_v40  }
 0x1a8   :  { %v197_v57 = vmul.f32 1.442695, %v196_v41 }
 0x218   :  { %v202_v42 = vpop.permute.xlu1 %201 }
 0x219   :  { %v203_v43 = vperm.slane %v202_v42, 0  ;;  %v204_v44 = vperm.slane %v202_v42, 1 }
 0x21b   :  { %v207_v45 = vsub.f32 %v177_v29, %v203_v43  ;;  %v208_v47 = vsub.f32 %v180_v32, %v204_v44 }
 0x21d   :  { %v209_v46 = vmul.f32 1.442695, %v207_v45  ;;  %v211_v48 = vmul.f32 1.442695, %v208_v47 }
 0x21f   :  { %354 = vpow2.f32 %v209_v46 }
 0x220   :  { %356 = vpow2.f32 %v211_v48 }
 0x221   :  { %358 = vpow2.f32 %v197_v57 }
 0x225   :  { %v355_v49 = vpop.eup %354 }
 0x226   :  { %218 = vperm.xlu2 %347, %v355_v49   ;;  %v357_v50 = vpop.eup %356 }
 0x227   :  { %v359_v58 = vpop.eup %358 }
 0x228   :  { %v214_v2 = vmul.f32 %v359_v58, %v213_v63 }
 0x22e   :  { %221 = vperm.xlu2 %347, %v357_v50  }
 0x280   :  { %v219_v51 = vpop.permute.xlu2 %218 }
 0x281   :  { %v223_v53 = vperm.slane %v219_v51, %v185_v31  ;;  %v242_v60 = vmul.f32 %v219_v51, %v576_v10 }
 0x283   :  { %v244_v62 = vsel %vm94_vm0, %v242_v60, 0.0 }
 0x284   :  { %v245_v1 = vrot.slane %v244_v62, 4 }
 0x286   :  { %v246_v6 = vadd.f32 %v245_v1, %v244_v62 }
 0x288   :  { %v222_v52 = vpop.permute.xlu2 %221  ;;  %v247_v8 = vrot.slane %v246_v6, 2 }
 0x289   :  { %v224_v54 = vperm.slane %v222_v52, %v185_v31  ;;  %v243_v59 = vmul.f32 %v222_v52, %v574_v9 }
 0x28a   :  { %v248_v11 = vadd.f32 %v247_v8, %v246_v6 }
 0x28b   :  { %v225_v55 = vsel %vm188_vm3, %v224_v54, %v223_v53  ;;  %v251_v61 = vsel %vm94_vm0, %v243_v59, 0.0 }
 0x28c   :  { %v227_v56 = vsel %vm191_vm4, %v225_v55, 0.0  ;;  %v252_v0 = vrot.slane %v251_v61, 4  ;;  %v249_v13 = vrot.slane %v248_v11, 1 }
 0x28d   :  { %228 = vadd.xlane.f32.xlu0 %v227_v56 }
 0x28e   :  { %v253_v4 = vadd.f32 %v252_v0, %v251_v61  ;;  %v250_v16 = vadd.f32 %v249_v13, %v248_v11 }
 0x290   :  { %v254_v7 = vrot.slane %v253_v4, 2 }
 0x292   :  { %v255_v9 = vadd.f32 %v254_v7, %v253_v4 }
 0x294   :  { %v256_v12 = vrot.slane %v255_v9, 1 }
 0x296   :  { %v257_v15 = vadd.f32 %v256_v12, %v255_v9 }
 0x298   :  { %v260_v19 = vsel %vm188_vm3, %v257_v15, %v250_v16 }
 0x2a1   :  { %236 = vperm.xlu0 %348, %v359_v58  }
 0x300   :  { %v229_v3 = vpop.xlane.xlu0 %228 }
 0x301   :  { %v230_v5 = vadd.f32 %v229_v3, %v214_v2 }
 0x303   :  { %232 = vst.msk [vmem:[#allocation4] sm:$0x3] %vm120_vm1, %v230_v5 }
 0x30a   :  { %v271_v10 = vld [vmem:[#allocation4] sm:$0x3] }
 0x30b   :  { %274 = vperm.xlu2 %347, %v271_v10  }
 0x313   :  { %v237_v17 = vpop.permute.xlu0 %236 }
 0x314   :  { %v239_v18 = vmul.f32 %v237_v17, %v233_v14 }
 0x316   :  { %v262_v20 = vadd.f32 %v260_v19, %v239_v18 }
 0x318   :  { %264 = vst.msk [vmem:[#allocation5] sm:$0x3] %vm118_vm2, %v262_v20 }
 0x31f   :  { %v270_v32 = vld [vmem:[#allocation5] sm:$0x3] }
 0x365   :  { %v275_v21 = vpop.permute.xlu2 %274 }
 0x366   :  { %360 = vrcp.f32 %v275_v21  ;;  %v288_v25 = vand.u32 2147483648, %v275_v21  ;;  %v286_v27 = vand.u32 2147483647, %v275_v21  ;;  %vm282_vm6 = vweird.f32 %v275_v21 }
 0x368   :  { %v289_v29 = vor.u32 1.1754944e-38, %v288_v25  ;;  %vm287_vm8 = vcmp.eq.f32.partialorder %v286_v27, 8.507059e+37 }
 0x36c   :  { %v361_v22 = vpop.eup %360 }
 0x36d   :  { %v278_v23 = vmul.f32 %v361_v22, %v275_v21  ;;  %vm283_vm5 = vweird.f32 %v361_v22 }
 0x36e   :  { %vm284_vm7 = vmor %vm282_vm6, %vm283_vm5 }
 0x36f   :  { %v279_v24 = vsub.f32 1.0, %v278_v23 }
 0x371   :  { %v280_v26 = vmul.f32 %v361_v22, %v279_v24 }
 0x373   :  { %v281_v28 = vadd.f32 %v361_v22, %v280_v26 }
 0x375   :  { %v285_v30 = vsel %vm284_vm7, %v361_v22, %v281_v28 }
 0x376   :  { %v290_v31 = vsel %vm287_vm8, %v289_v29, %v285_v30 }
 0x377   :  { %v291_v33 = vmul.f32 %v290_v31, %v270_v32 }
 0x379   :  { %292 = vst.msk [vmem:[#allocation14] sm:$0x3] %vm118_vm2, %v291_v33 }
 0x37a   :  { %303 = dma.vmem_to_hbm [thread:$0]  %s299_s21, 32, %s301_s24, [#allocation8]  }
 0x37b   :  { %512 = dma.done.wait [#allocation8], 32  }
 0x37c   :  { %513 = vsyncadd [#allocation8], 4294967264 }
 0x37d   :  { %514 = dma.done.wait [#allocation16], 32  }
 0x37e   :  { %515 = vsyncadd [#allocation16], 4294967264 }
 0x37f   :  { %323 = vsyncpa [#allocation7], 1 }
 0x380   :  { %324 = vsyncpa [#allocation10], 1 }
 0x381   :  { %325 = vsyncpa [#allocation13], 1 }
 0x382   :  { %326 = vsyncpa [#allocation8], 1 }
 0x383   :  { %327 = vsyncpa [#allocation16], 1 }

</bundles_post_ra>
